<compile_context>
chip_gen: v7x
topology: tpu7x:2x2x1
jax: 0.10.0
libtpu: 0.0.40
codegen_flags: <defaults>
</compile_context>

<pallas_src>
import functools

import numpy as np

import jax
import jax.numpy as jnp
from jax import lax
from jax.experimental import pallas as pl
from jax.experimental.pallas import tpu as pltpu

TOKEN_ATTEND_SELF_VALUE = -0.0005
_NORMALIZE_EPS = 1e-12  # F.normalize default eps


def _consensus_kernel(x_ref, o_ref, *, n, l, d, side, scale, attend_self,
                      radius, mxu_dtype, approx_recip):
    """One batch per grid step. x_ref / o_ref block shape: (1, n, l*d)."""
    f32 = jnp.float32

    # ---- grid-invariant (n, n) masks, built from iotas (cheap VPU work) ----
    ii = lax.broadcasted_iota(jnp.int32, (n, n), 0)
    jj = lax.broadcasted_iota(jnp.int32, (n, n), 1)
    diag = ii == jj

    if radius > 0:
        # Row / col of token t on the (side x side) patch grid, without vector
        # integer division: floor((t + 0.5) / side) is exact for these sizes.
        ti = ii.astype(f32)
        tj = jj.astype(f32)
        inv_side = f32(1.0 / side)
        ri = jnp.floor((ti + 0.5) * inv_side)
        rj = jnp.floor((tj + 0.5) * inv_side)
        ci = ti - ri * side
        cj = tj - rj * side
        dr = ri - rj
        dc = ci - cj
        dist2 = dr * dr + dc * dc
        non_local = dist2 > f32(float(radius) ** 2)   # dist > r  <=>  dist^2 > r^2
        neg_max = f32(-jnp.finfo(jnp.float32).max)

    # ---- per-level attention (static unrolled loop; l is small) ----
    for li in range(l):
        lo = li * d
        x = x_ref[0, :, lo:lo + d].astype(f32)                    # (n, d); q == v

        # k = F.normalize(x, dim=-1) = x / max(||x||, eps)
        sumsq = jnp.sum(x * x, axis=-1, keepdims=True)
        k = x * lax.rsqrt(jnp.maximum(sumsq, f32(_NORMALIZE_EPS ** 2)))

        q_m = x.astype(mxu_dtype)                                 # also used as v
        k_m = k.astype(mxu_dtype)

        # sim[i, j] = <q_i, k_j> * d**-0.5  (contract last dims on the MXU)
        sim = lax.dot_general(q_m, k_m, (((1,), (1,)), ((), ())),
                              preferred_element_type=f32) * scale

        if not attend_self:
            sim = jnp.where(diag, f32(TOKEN_ATTEND_SELF_VALUE), sim)
        if radius > 0:
            sim = jnp.where(non_local, neg_max, sim)

        # softmax over j (f32 math)
        m = jnp.max(sim, axis=-1, keepdims=True)
        e = jnp.exp(sim - m)
        attn = e * pl.reciprocal(jnp.sum(e, axis=-1, keepdims=True),
                                 approx=approx_recip)

        out = lax.dot_general(attn.astype(mxu_dtype), q_m,
                              (((1,), (0,)), ((), ())),
                              preferred_element_type=f32)          # (n, d)
        o_ref[0, :, lo:lo + d] = out.astype(o_ref.dtype)


def consensus_attention(levels, *, num_patches_side, attend_self=True,
                        local_consensus_radius=0,
                        matmul_dtype=jnp.bfloat16):
    """levels: (b, n, l, d) float array; returns (b, n, l, d).

    matmul_dtype: MXU operand dtype (softmax / accumulation stay in f32).
    Default bf16 for throughput; pass jnp.float32 for exact f32 semantics.
    """
    b, n, l, d = levels.shape
    scale = float(d) ** -0.5
    mxu_dtype = np.dtype(matmul_dtype)
    approx_recip = mxu_dtype != np.dtype(np.float32)

    # Free reshape (trailing dims contiguous): each grid step owns one batch's
    # lane-dense (n, l*d) slab -- no HBM transposes, big contiguous DMAs.
    x2 = levels.reshape(b, n, l * d)

    spec = pl.BlockSpec((1, n, l * d), lambda bi: (bi, 0, 0))
    kern = functools.partial(
        _consensus_kernel, n=n, l=l, d=d, side=num_patches_side, scale=scale,
        attend_self=attend_self, radius=local_consensus_radius,
        mxu_dtype=mxu_dtype, approx_recip=approx_recip)

    itemsize = levels.dtype.itemsize
    cost = pl.CostEstimate(
        flops=int(4 * b * l * n * n * d),
        transcendentals=int(b * l * n * n),
        bytes_accessed=int(2 * b * n * l * d * itemsize))

    out = pl.pallas_call(
        kern,
        out_shape=jax.ShapeDtypeStruct((b, n, l * d), levels.dtype),
        grid_spec=pltpu.PrefetchScalarGridSpec(
            num_scalar_prefetch=0,
            grid=(b,),                       # one batch slab per step
            in_specs=[spec],
            out_specs=spec),
        compiler_params=pltpu.CompilerParams(
            dimension_semantics=("parallel",),
            vmem_limit_bytes=48 * 1024 * 1024),
        cost_estimate=cost,
    )(x2)

    return out.reshape(b, n, l, d)


def _reference(levels, *, num_patches_side, attend_self=True,
               local_consensus_radius=0):
    """Pure-JAX f32 reference mirroring the PyTorch forward."""
    b, n, l, d = levels.shape
    q = levels
    norm = jnp.sqrt(jnp.sum(levels * levels, axis=-1, keepdims=True))
    k = levels / jnp.maximum(norm, _NORMALIZE_EPS)
    sim = jnp.einsum('bild,bjld->blij', q, k) * d ** -0.5
    if not attend_self:
        eye = jnp.eye(n, dtype=bool)[None, None]
        sim = jnp.where(eye, TOKEN_ATTEND_SELF_VALUE, sim)
    if local_consensus_radius > 0:
        side = num_patches_side
        yy, xx = jnp.meshgrid(jnp.arange(side), jnp.arange(side), indexing='ij')
        coors = jnp.stack([yy.reshape(-1), xx.reshape(-1)], -1).astype(jnp.float32)
        dist = jnp.sqrt(jnp.sum((coors[:, None, :] - coors[None, :, :]) ** 2, -1))
        non_local = (dist > local_consensus_radius)[None, None]
        sim = jnp.where(non_local, -jnp.finfo(sim.dtype).max, sim)
    attn = jax.nn.softmax(sim, axis=-1)
    return jnp.einsum('blij,bjld->bild', attn, levels)


if __name__ == "__main__":
    key = jax.random.PRNGKey(0)
    b, side, l, d = 2, 4, 6, 32
    n = side * side                                     # 16 tokens
    levels = jax.random.normal(key, (b, n, l, d), dtype=jnp.float32)

    # 1) Exact f32 MXU path (matches PyTorch f32 semantics) -- tight tolerance.
    #    Glom default config: consensus_self=False -> attend_self=False.
    out_exact = jax.block_until_ready(
        consensus_attention(levels, num_patches_side=side, attend_self=False,
                            local_consensus_radius=0,
                            matmul_dtype=jnp.float32))
    ref = _reference(levels, num_patches_side=side, attend_self=False,
                     local_consensus_radius=0)
    assert out_exact.shape == (b, n, l, d)
    assert jnp.allclose(out_exact, ref, atol=1e-4, rtol=1e-4)

    # 2) Default bf16-MXU fast path -- looser tolerance vs f32 reference.
    out_bf16 = jax.block_until_ready(
        consensus_attention(levels, num_patches_side=side, attend_self=False,
                            local_consensus_radius=0))
    assert jnp.allclose(out_bf16, ref, atol=3e-2, rtol=3e-2)

    # 3) attend_self=True + local consensus radius (mask built in-kernel).
    out_loc = jax.block_until_ready(
        consensus_attention(levels, num_patches_side=side, attend_self=True,
                            local_consensus_radius=1,
                            matmul_dtype=jnp.float32))
    ref_loc = _reference(levels, num_patches_side=side, attend_self=True,
                         local_consensus_radius=1)
    assert jnp.allclose(out_loc, ref_loc, atol=1e-4, rtol=1e-4)

    print("KERNEL_OK")
</pallas_src>

<mosaic_0001>
module attributes {stable_mosaic.version = 11 : i64} {
  func.func @_consensus_kernel(%arg0: i32, %arg1: memref<1x16x192xf32, #tpu.memory_space<vmem>>, %arg2: memref<1x16x192xf32, #tpu.memory_space<vmem>>) attributes {dimension_semantics = [#tpu.dimension_semantics<parallel>], iteration_bounds = array<i64: 2>, scalar_prefetch = 0 : i64, scratch_operands = 0 : i64, tpu.core_type = #tpu.core_type<tc>, window_params = [{transform_indices = @transform_0, window_bounds = array<i64: 1, 16, 192>}, {transform_indices = @transform_1, window_bounds = array<i64: 1, 16, 192>}]} {
    %0 = tpu.iota {dimensions = array<i32: 0>} : vector<16x16xi32>
    %1 = tpu.iota {dimensions = array<i32: 1>} : vector<16x16xi32>
    %2 = arith.cmpi eq, %0, %1 : vector<16x16xi32>
    %c0 = arith.constant 0 : index
    %c0_0 = arith.constant 0 : index
    %c0_1 = arith.constant 0 : index
    %3 = vector.load %arg1[%c0, %c0_0, %c0_1] : memref<1x16x192xf32, #tpu.memory_space<vmem>>, vector<1x16x32xf32>
    %4 = vector.shape_cast %3 : vector<1x16x32xf32> to vector<16x32xf32>
    %5 = arith.mulf %4, %4 : vector<16x32xf32>
    %cst = arith.constant dense<0.000000e+00> : vector<16xf32>
    %6 = vector.multi_reduction <add>, %5, %cst [1] : vector<16x32xf32> to vector<16xf32>
    %7 = vector.shape_cast %6 : vector<16xf32> to vector<16x1xf32>
    %cst_2 = arith.constant 1.000000e-24 : f32
    %8 = vector.broadcast %cst_2 : f32 to vector<16x1xf32>
    %9 = arith.maximumf %7, %8 : vector<16x1xf32>
    %10 = math.rsqrt %9 : vector<16x1xf32>
    %11 = vector.broadcast %10 : vector<16x1xf32> to vector<16x32xf32>
    %12 = arith.mulf %4, %11 : vector<16x32xf32>
    %cst_3 = arith.constant dense<0.000000e+00> : vector<16x16xf32>
    %13 = tpu.matmul %4, %12, %cst_3 {dimension_numbers = #tpu.dot_dimension_numbers<[1], [1], [0], [0], [0, 0, 1, 0], [], []>} : vector<16x32xf32>, vector<16x32xf32>, vector<16x16xf32> -> vector<16x16xf32>
    %cst_4 = arith.constant 0.176776692 : f32
    %14 = vector.broadcast %cst_4 : f32 to vector<16x16xf32>
    %15 = arith.mulf %13, %14 : vector<16x16xf32>
    %cst_5 = arith.constant -5.000000e-04 : f32
    %16 = vector.broadcast %cst_5 : f32 to vector<16x16xf32>
    %17 = arith.select %2, %16, %15 : vector<16x16xi1>, vector<16x16xf32>
    %cst_6 = arith.constant dense<0xFF800000> : vector<16xf32>
    %18 = vector.multi_reduction <maximumf>, %17, %cst_6 [1] : vector<16x16xf32> to vector<16xf32>
    %19 = vector.shape_cast %18 : vector<16xf32> to vector<16x1xf32>
    %20 = vector.broadcast %19 : vector<16x1xf32> to vector<16x16xf32>
    %21 = arith.subf %17, %20 : vector<16x16xf32>
    %22 = math.exp %21 : vector<16x16xf32>
    %cst_7 = arith.constant dense<0.000000e+00> : vector<16xf32>
    %23 = vector.multi_reduction <add>, %22, %cst_7 [1] : vector<16x16xf32> to vector<16xf32>
    %24 = vector.shape_cast %23 : vector<16xf32> to vector<16x1xf32>
    %25 = tpu.reciprocal %24 : vector<16x1xf32> -> vector<16x1xf32>
    %26 = vector.broadcast %25 : vector<16x1xf32> to vector<16x16xf32>
    %27 = arith.mulf %22, %26 : vector<16x16xf32>
    %cst_8 = arith.constant dense<0.000000e+00> : vector<16x32xf32>
    %28 = tpu.matmul %27, %4, %cst_8 {dimension_numbers = #tpu.dot_dimension_numbers<[1], [0], [0], [1], [0, 0, 1, 1], [], []>} : vector<16x16xf32>, vector<16x32xf32>, vector<16x32xf32> -> vector<16x32xf32>
    %c0_9 = arith.constant 0 : index
    %c0_10 = arith.constant 0 : index
    %c0_11 = arith.constant 0 : index
    %29 = vector.load %arg2[%c0_9, %c0_10, %c0_11] : memref<1x16x192xf32, #tpu.memory_space<vmem>>, vector<1x16x32xf32>
    %30 = vector.shape_cast %29 : vector<1x16x32xf32> to vector<16x32xf32>
    %31 = vector.shape_cast %28 : vector<16x32xf32> to vector<1x16x32xf32>
    tpu.vector_store %arg2[%c0_9, %c0_10, %c0_11], %31 {strides = array<i32>} : memref<1x16x192xf32, #tpu.memory_space<vmem>>, vector<1x16x32xf32>,
    %c0_12 = arith.constant 0 : index
    %c0_13 = arith.constant 0 : index
    %c32 = arith.constant 32 : index
    %32 = vector.load %arg1[%c0_12, %c0_13, %c32] : memref<1x16x192xf32, #tpu.memory_space<vmem>>, vector<1x16x32xf32>
    %33 = vector.shape_cast %32 : vector<1x16x32xf32> to vector<16x32xf32>
    %34 = arith.mulf %33, %33 : vector<16x32xf32>
    %cst_14 = arith.constant dense<0.000000e+00> : vector<16xf32>
    %35 = vector.multi_reduction <add>, %34, %cst_14 [1] : vector<16x32xf32> to vector<16xf32>
    %36 = vector.shape_cast %35 : vector<16xf32> to vector<16x1xf32>
    %cst_15 = arith.constant 1.000000e-24 : f32
    %37 = vector.broadcast %cst_15 : f32 to vector<16x1xf32>
    %38 = arith.maximumf %36, %37 : vector<16x1xf32>
    %39 = math.rsqrt %38 : vector<16x1xf32>
    %40 = vector.broadcast %39 : vector<16x1xf32> to vector<16x32xf32>
    %41 = arith.mulf %33, %40 : vector<16x32xf32>
    %cst_16 = arith.constant dense<0.000000e+00> : vector<16x16xf32>
    %42 = tpu.matmul %33, %41, %cst_16 {dimension_numbers = #tpu.dot_dimension_numbers<[1], [1], [0], [0], [0, 0, 1, 0], [], []>} : vector<16x32xf32>, vector<16x32xf32>, vector<16x16xf32> -> vector<16x16xf32>
    %cst_17 = arith.constant 0.176776692 : f32
    %43 = vector.broadcast %cst_17 : f32 to vector<16x16xf32>
    %44 = arith.mulf %42, %43 : vector<16x16xf32>
    %cst_18 = arith.constant -5.000000e-04 : f32
    %45 = vector.broadcast %cst_18 : f32 to vector<16x16xf32>
    %46 = arith.select %2, %45, %44 : vector<16x16xi1>, vector<16x16xf32>
    %cst_19 = arith.constant dense<0xFF800000> : vector<16xf32>
    %47 = vector.multi_reduction <maximumf>, %46, %cst_19 [1] : vector<16x16xf32> to vector<16xf32>
    %48 = vector.shape_cast %47 : vector<16xf32> to vector<16x1xf32>
    %49 = vector.broadcast %48 : vector<16x1xf32> to vector<16x16xf32>
    %50 = arith.subf %46, %49 : vector<16x16xf32>
    %51 = math.exp %50 : vector<16x16xf32>
    %cst_20 = arith.constant dense<0.000000e+00> : vector<16xf32>
    %52 = vector.multi_reduction <add>, %51, %cst_20 [1] : vector<16x16xf32> to vector<16xf32>
    %53 = vector.shape_cast %52 : vector<16xf32> to vector<16x1xf32>
    %54 = tpu.reciprocal %53 : vector<16x1xf32> -> vector<16x1xf32>
    %55 = vector.broadcast %54 : vector<16x1xf32> to vector<16x16xf32>
    %56 = arith.mulf %51, %55 : vector<16x16xf32>
    %cst_21 = arith.constant dense<0.000000e+00> : vector<16x32xf32>
    %57 = tpu.matmul %56, %33, %cst_21 {dimension_numbers = #tpu.dot_dimension_numbers<[1], [0], [0], [1], [0, 0, 1, 1], [], []>} : vector<16x16xf32>, vector<16x32xf32>, vector<16x32xf32> -> vector<16x32xf32>
    %c0_22 = arith.constant 0 : index
    %c0_23 = arith.constant 0 : index
    %c32_24 = arith.constant 32 : index
    %58 = vector.load %arg2[%c0_22, %c0_23, %c32_24] : memref<1x16x192xf32, #tpu.memory_space<vmem>>, vector<1x16x32xf32>
    %59 = vector.shape_cast %58 : vector<1x16x32xf32> to vector<16x32xf32>
    %60 = vector.shape_cast %57 : vector<16x32xf32> to vector<1x16x32xf32>
    tpu.vector_store %arg2[%c0_22, %c0_23, %c32_24], %60 {strides = array<i32>} : memref<1x16x192xf32, #tpu.memory_space<vmem>>, vector<1x16x32xf32>,
    %c0_25 = arith.constant 0 : index
    %c0_26 = arith.constant 0 : index
    %c64 = arith.constant 64 : index
    %61 = vector.load %arg1[%c0_25, %c0_26, %c64] : memref<1x16x192xf32, #tpu.memory_space<vmem>>, vector<1x16x32xf32>
    %62 = vector.shape_cast %61 : vector<1x16x32xf32> to vector<16x32xf32>
    %63 = arith.mulf %62, %62 : vector<16x32xf32>
    %cst_27 = arith.constant dense<0.000000e+00> : vector<16xf32>
    %64 = vector.multi_reduction <add>, %63, %cst_27 [1] : vector<16x32xf32> to vector<16xf32>
    %65 = vector.shape_cast %64 : vector<16xf32> to vector<16x1xf32>
    %cst_28 = arith.constant 1.000000e-24 : f32
    %66 = vector.broadcast %cst_28 : f32 to vector<16x1xf32>
    %67 = arith.maximumf %65, %66 : vector<16x1xf32>
    %68 = math.rsqrt %67 : vector<16x1xf32>
    %69 = vector.broadcast %68 : vector<16x1xf32> to vector<16x32xf32>
    %70 = arith.mulf %62, %69 : vector<16x32xf32>
    %cst_29 = arith.constant dense<0.000000e+00> : vector<16x16xf32>
    %71 = tpu.matmul %62, %70, %cst_29 {dimension_numbers = #tpu.dot_dimension_numbers<[1], [1], [0], [0], [0, 0, 1, 0], [], []>} : vector<16x32xf32>, vector<16x32xf32>, vector<16x16xf32> -> vector<16x16xf32>
    %cst_30 = arith.constant 0.176776692 : f32
    %72 = vector.broadcast %cst_30 : f32 to vector<16x16xf32>
    %73 = arith.mulf %71, %72 : vector<16x16xf32>
    %cst_31 = arith.constant -5.000000e-04 : f32
    %74 = vector.broadcast %cst_31 : f32 to vector<16x16xf32>
    %75 = arith.select %2, %74, %73 : vector<16x16xi1>, vector<16x16xf32>
    %cst_32 = arith.constant dense<0xFF800000> : vector<16xf32>
    %76 = vector.multi_reduction <maximumf>, %75, %cst_32 [1] : vector<16x16xf32> to vector<16xf32>
    %77 = vector.shape_cast %76 : vector<16xf32> to vector<16x1xf32>
    %78 = vector.broadcast %77 : vector<16x1xf32> to vector<16x16xf32>
    %79 = arith.subf %75, %78 : vector<16x16xf32>
    %80 = math.exp %79 : vector<16x16xf32>
    %cst_33 = arith.constant dense<0.000000e+00> : vector<16xf32>
    %81 = vector.multi_reduction <add>, %80, %cst_33 [1] : vector<16x16xf32> to vector<16xf32>
    %82 = vector.shape_cast %81 : vector<16xf32> to vector<16x1xf32>
    %83 = tpu.reciprocal %82 : vector<16x1xf32> -> vector<16x1xf32>
    %84 = vector.broadcast %83 : vector<16x1xf32> to vector<16x16xf32>
    %85 = arith.mulf %80, %84 : vector<16x16xf32>
    %cst_34 = arith.constant dense<0.000000e+00> : vector<16x32xf32>
    %86 = tpu.matmul %85, %62, %cst_34 {dimension_numbers = #tpu.dot_dimension_numbers<[1], [0], [0], [1], [0, 0, 1, 1], [], []>} : vector<16x16xf32>, vector<16x32xf32>, vector<16x32xf32> -> vector<16x32xf32>
    %c0_35 = arith.constant 0 : index
    %c0_36 = arith.constant 0 : index
    %c64_37 = arith.constant 64 : index
    %87 = vector.load %arg2[%c0_35, %c0_36, %c64_37] : memref<1x16x192xf32, #tpu.memory_space<vmem>>, vector<1x16x32xf32>
    %88 = vector.shape_cast %87 : vector<1x16x32xf32> to vector<16x32xf32>
    %89 = vector.shape_cast %86 : vector<16x32xf32> to vector<1x16x32xf32>
    tpu.vector_store %arg2[%c0_35, %c0_36, %c64_37], %89 {strides = array<i32>} : memref<1x16x192xf32, #tpu.memory_space<vmem>>, vector<1x16x32xf32>,
    %c0_38 = arith.constant 0 : index
    %c0_39 = arith.constant 0 : index
    %c96 = arith.constant 96 : index
    %90 = vector.load %arg1[%c0_38, %c0_39, %c96] : memref<1x16x192xf32, #tpu.memory_space<vmem>>, vector<1x16x32xf32>
    %91 = vector.shape_cast %90 : vector<1x16x32xf32> to vector<16x32xf32>
    %92 = arith.mulf %91, %91 : vector<16x32xf32>
    %cst_40 = arith.constant dense<0.000000e+00> : vector<16xf32>
    %93 = vector.multi_reduction <add>, %92, %cst_40 [1] : vector<16x32xf32> to vector<16xf32>
    %94 = vector.shape_cast %93 : vector<16xf32> to vector<16x1xf32>
    %cst_41 = arith.constant 1.000000e-24 : f32
    %95 = vector.broadcast %cst_41 : f32 to vector<16x1xf32>
    %96 = arith.maximumf %94, %95 : vector<16x1xf32>
    %97 = math.rsqrt %96 : vector<16x1xf32>
    %98 = vector.broadcast %97 : vector<16x1xf32> to vector<16x32xf32>
    %99 = arith.mulf %91, %98 : vector<16x32xf32>
    %cst_42 = arith.constant dense<0.000000e+00> : vector<16x16xf32>
    %100 = tpu.matmul %91, %99, %cst_42 {dimension_numbers = #tpu.dot_dimension_numbers<[1], [1], [0], [0], [0, 0, 1, 0], [], []>} : vector<16x32xf32>, vector<16x32xf32>, vector<16x16xf32> -> vector<16x16xf32>
    %cst_43 = arith.constant 0.176776692 : f32
    %101 = vector.broadcast %cst_43 : f32 to vector<16x16xf32>
    %102 = arith.mulf %100, %101 : vector<16x16xf32>
    %cst_44 = arith.constant -5.000000e-04 : f32
    %103 = vector.broadcast %cst_44 : f32 to vector<16x16xf32>
    %104 = arith.select %2, %103, %102 : vector<16x16xi1>, vector<16x16xf32>
    %cst_45 = arith.constant dense<0xFF800000> : vector<16xf32>
    %105 = vector.multi_reduction <maximumf>, %104, %cst_45 [1] : vector<16x16xf32> to vector<16xf32>
    %106 = vector.shape_cast %105 : vector<16xf32> to vector<16x1xf32>
    %107 = vector.broadcast %106 : vector<16x1xf32> to vector<16x16xf32>
    %108 = arith.subf %104, %107 : vector<16x16xf32>
    %109 = math.exp %108 : vector<16x16xf32>
    %cst_46 = arith.constant dense<0.000000e+00> : vector<16xf32>
    %110 = vector.multi_reduction <add>, %109, %cst_46 [1] : vector<16x16xf32> to vector<16xf32>
    %111 = vector.shape_cast %110 : vector<16xf32> to vector<16x1xf32>
    %112 = tpu.reciprocal %111 : vector<16x1xf32> -> vector<16x1xf32>
    %113 = vector.broadcast %112 : vector<16x1xf32> to vector<16x16xf32>
    %114 = arith.mulf %109, %113 : vector<16x16xf32>
    %cst_47 = arith.constant dense<0.000000e+00> : vector<16x32xf32>
    %115 = tpu.matmul %114, %91, %cst_47 {dimension_numbers = #tpu.dot_dimension_numbers<[1], [0], [0], [1], [0, 0, 1, 1], [], []>} : vector<16x16xf32>, vector<16x32xf32>, vector<16x32xf32> -> vector<16x32xf32>
    %c0_48 = arith.constant 0 : index
    %c0_49 = arith.constant 0 : index
    %c96_50 = arith.constant 96 : index
    %116 = vector.load %arg2[%c0_48, %c0_49, %c96_50] : memref<1x16x192xf32, #tpu.memory_space<vmem>>, vector<1x16x32xf32>
    %117 = vector.shape_cast %116 : vector<1x16x32xf32> to vector<16x32xf32>
    %118 = vector.shape_cast %115 : vector<16x32xf32> to vector<1x16x32xf32>
    tpu.vector_store %arg2[%c0_48, %c0_49, %c96_50], %118 {strides = array<i32>} : memref<1x16x192xf32, #tpu.memory_space<vmem>>, vector<1x16x32xf32>,
    %c0_51 = arith.constant 0 : index
    %c0_52 = arith.constant 0 : index
    %c128 = arith.constant 128 : index
    %119 = vector.load %arg1[%c0_51, %c0_52, %c128] : memref<1x16x192xf32, #tpu.memory_space<vmem>>, vector<1x16x32xf32>
    %120 = vector.shape_cast %119 : vector<1x16x32xf32> to vector<16x32xf32>
    %121 = arith.mulf %120, %120 : vector<16x32xf32>
    %cst_53 = arith.constant dense<0.000000e+00> : vector<16xf32>
    %122 = vector.multi_reduction <add>, %121, %cst_53 [1] : vector<16x32xf32> to vector<16xf32>
    %123 = vector.shape_cast %122 : vector<16xf32> to vector<16x1xf32>
    %cst_54 = arith.constant 1.000000e-24 : f32
    %124 = vector.broadcast %cst_54 : f32 to vector<16x1xf32>
    %125 = arith.maximumf %123, %124 : vector<16x1xf32>
    %126 = math.rsqrt %125 : vector<16x1xf32>
    %127 = vector.broadcast %126 : vector<16x1xf32> to vector<16x32xf32>
    %128 = arith.mulf %120, %127 : vector<16x32xf32>
    %cst_55 = arith.constant dense<0.000000e+00> : vector<16x16xf32>
    %129 = tpu.matmul %120, %128, %cst_55 {dimension_numbers = #tpu.dot_dimension_numbers<[1], [1], [0], [0], [0, 0, 1, 0], [], []>} : vector<16x32xf32>, vector<16x32xf32>, vector<16x16xf32> -> vector<16x16xf32>
    %cst_56 = arith.constant 0.176776692 : f32
    %130 = vector.broadcast %cst_56 : f32 to vector<16x16xf32>
    %131 = arith.mulf %129, %130 : vector<16x16xf32>
    %cst_57 = arith.constant -5.000000e-04 : f32
    %132 = vector.broadcast %cst_57 : f32 to vector<16x16xf32>
    %133 = arith.select %2, %132, %131 : vector<16x16xi1>, vector<16x16xf32>
    %cst_58 = arith.constant dense<0xFF800000> : vector<16xf32>
    %134 = vector.multi_reduction <maximumf>, %133, %cst_58 [1] : vector<16x16xf32> to vector<16xf32>
    %135 = vector.shape_cast %134 : vector<16xf32> to vector<16x1xf32>
    %136 = vector.broadcast %135 : vector<16x1xf32> to vector<16x16xf32>
    %137 = arith.subf %133, %136 : vector<16x16xf32>
    %138 = math.exp %137 : vector<16x16xf32>
    %cst_59 = arith.constant dense<0.000000e+00> : vector<16xf32>
    %139 = vector.multi_reduction <add>, %138, %cst_59 [1] : vector<16x16xf32> to vector<16xf32>
    %140 = vector.shape_cast %139 : vector<16xf32> to vector<16x1xf32>
    %141 = tpu.reciprocal %140 : vector<16x1xf32> -> vector<16x1xf32>
    %142 = vector.broadcast %141 : vector<16x1xf32> to vector<16x16xf32>
    %143 = arith.mulf %138, %142 : vector<16x16xf32>
    %cst_60 = arith.constant dense<0.000000e+00> : vector<16x32xf32>
    %144 = tpu.matmul %143, %120, %cst_60 {dimension_numbers = #tpu.dot_dimension_numbers<[1], [0], [0], [1], [0, 0, 1, 1], [], []>} : vector<16x16xf32>, vector<16x32xf32>, vector<16x32xf32> -> vector<16x32xf32>
    %c0_61 = arith.constant 0 : index
    %c0_62 = arith.constant 0 : index
    %c128_63 = arith.constant 128 : index
    %145 = vector.load %arg2[%c0_61, %c0_62, %c128_63] : memref<1x16x192xf32, #tpu.memory_space<vmem>>, vector<1x16x32xf32>
    %146 = vector.shape_cast %145 : vector<1x16x32xf32> to vector<16x32xf32>
    %147 = vector.shape_cast %144 : vector<16x32xf32> to vector<1x16x32xf32>
    tpu.vector_store %arg2[%c0_61, %c0_62, %c128_63], %147 {strides = array<i32>} : memref<1x16x192xf32, #tpu.memory_space<vmem>>, vector<1x16x32xf32>,
    %c0_64 = arith.constant 0 : index
    %c0_65 = arith.constant 0 : index
    %c160 = arith.constant 160 : index
    %148 = vector.load %arg1[%c0_64, %c0_65, %c160] : memref<1x16x192xf32, #tpu.memory_space<vmem>>, vector<1x16x32xf32>
    %149 = vector.shape_cast %148 : vector<1x16x32xf32> to vector<16x32xf32>
    %150 = arith.mulf %149, %149 : vector<16x32xf32>
    %cst_66 = arith.constant dense<0.000000e+00> : vector<16xf32>
    %151 = vector.multi_reduction <add>, %150, %cst_66 [1] : vector<16x32xf32> to vector<16xf32>
    %152 = vector.shape_cast %151 : vector<16xf32> to vector<16x1xf32>
    %cst_67 = arith.constant 1.000000e-24 : f32
    %153 = vector.broadcast %cst_67 : f32 to vector<16x1xf32>
    %154 = arith.maximumf %152, %153 : vector<16x1xf32>
    %155 = math.rsqrt %154 : vector<16x1xf32>
    %156 = vector.broadcast %155 : vector<16x1xf32> to vector<16x32xf32>
    %157 = arith.mulf %149, %156 : vector<16x32xf32>
    %cst_68 = arith.constant dense<0.000000e+00> : vector<16x16xf32>
    %158 = tpu.matmul %149, %157, %cst_68 {dimension_numbers = #tpu.dot_dimension_numbers<[1], [1], [0], [0], [0, 0, 1, 0], [], []>} : vector<16x32xf32>, vector<16x32xf32>, vector<16x16xf32> -> vector<16x16xf32>
    %cst_69 = arith.constant 0.176776692 : f32
    %159 = vector.broadcast %cst_69 : f32 to vector<16x16xf32>
    %160 = arith.mulf %158, %159 : vector<16x16xf32>
    %cst_70 = arith.constant -5.000000e-04 : f32
    %161 = vector.broadcast %cst_70 : f32 to vector<16x16xf32>
    %162 = arith.select %2, %161, %160 : vector<16x16xi1>, vector<16x16xf32>
    %cst_71 = arith.constant dense<0xFF800000> : vector<16xf32>
    %163 = vector.multi_reduction <maximumf>, %162, %cst_71 [1] : vector<16x16xf32> to vector<16xf32>
    %164 = vector.shape_cast %163 : vector<16xf32> to vector<16x1xf32>
    %165 = vector.broadcast %164 : vector<16x1xf32> to vector<16x16xf32>
    %166 = arith.subf %162, %165 : vector<16x16xf32>
    %167 = math.exp %166 : vector<16x16xf32>
    %cst_72 = arith.constant dense<0.000000e+00> : vector<16xf32>
    %168 = vector.multi_reduction <add>, %167, %cst_72 [1] : vector<16x16xf32> to vector<16xf32>
    %169 = vector.shape_cast %168 : vector<16xf32> to vector<16x1xf32>
    %170 = tpu.reciprocal %169 : vector<16x1xf32> -> vector<16x1xf32>
    %171 = vector.broadcast %170 : vector<16x1xf32> to vector<16x16xf32>
    %172 = arith.mulf %167, %171 : vector<16x16xf32>
    %cst_73 = arith.constant dense<0.000000e+00> : vector<16x32xf32>
    %173 = tpu.matmul %172, %149, %cst_73 {dimension_numbers = #tpu.dot_dimension_numbers<[1], [0], [0], [1], [0, 0, 1, 1], [], []>} : vector<16x16xf32>, vector<16x32xf32>, vector<16x32xf32> -> vector<16x32xf32>
    %c0_74 = arith.constant 0 : index
    %c0_75 = arith.constant 0 : index
    %c160_76 = arith.constant 160 : index
    %174 = vector.load %arg2[%c0_74, %c0_75, %c160_76] : memref<1x16x192xf32, #tpu.memory_space<vmem>>, vector<1x16x32xf32>
    %175 = vector.shape_cast %174 : vector<1x16x32xf32> to vector<16x32xf32>
    %176 = vector.shape_cast %173 : vector<16x32xf32> to vector<1x16x32xf32>
    tpu.vector_store %arg2[%c0_74, %c0_75, %c160_76], %176 {strides = array<i32>} : memref<1x16x192xf32, #tpu.memory_space<vmem>>, vector<1x16x32xf32>,
    return
  }
  func.func @transform_0(%arg0: i32) -> (i32, i32, i32) {
    %c0_i32 = arith.constant 0 : i32
    %c0_i32_0 = arith.constant 0 : i32
    %c0_i32_1 = arith.constant 0 : i32
    return %arg0, %c0_i32, %c0_i32_0 : i32, i32, i32
  }
  func.func @transform_1(%arg0: i32) -> (i32, i32, i32) {
    %c0_i32 = arith.constant 0 : i32
    %c0_i32_0 = arith.constant 0 : i32
    %c0_i32_1 = arith.constant 0 : i32
    return %arg0, %c0_i32, %c0_i32_0 : i32, i32, i32
  }
}

</mosaic_0001>

<bundles_post_ra>
// kernel: tpu_custom_call.1
= control target key start
LH: loop header
LB: loop body
LE: loop exit
PB: predicated region body
PF: predicated region fallthrough
CT: control target
= control target key end

     0   :  { %6 = vsyncpa [#allocation3], 0  ;;  %s2535_s0 = inlined_call_operand.hbm [shape: f32[2,16,192], index: 0, kind: input, shape index: {}]   ;;  %s2536_s1 = inlined_call_operand.hbm [shape: f32[2,16,192], index: 1, kind: output, shape index: {}]  }
   0x1   :  { %8 = vsyncpa [#allocation3 + $0x1], 0 }
   0x2   :  { %9 = vsyncpa [#allocation4], 0 }
   0x3   :  { %11 = vsyncpa [#allocation4 + $0x1], 0  ;;  %s2116_s6 = smov 0   ;;  %s2118_s7 = smov 0  }
   0x4   :  { %s2120_s8 = smov 0   ;;  %s2122_s9 = smov 0  }
   0x5 LB: > { %s2137_s10 = sadd.s32 4294967295, %s2095_s9   ;;  %s1610_s11 = sadd.s32 4294967294, %s2095_s9   ;;  %s2095_s9 = sphi %s2122_s9, %s2555_s9   ;;  %s2091_s8 = sphi %s2120_s8, %s2554_s8   ;;  %s2087_s7 = sphi %s2118_s7, %s2553_s7   ;;  %s2083_s6 = sphi %s2116_s6, %s2552_s6  }
   0x6   : > { %s2141_s12 = sadd.s32 1, %s2095_s9   ;;  %s24_s13 = sadd.s32 1, %s2091_s8 }
   0x7   : > { %s21_s14 = ssub.s32 %s2095_s9, %s2141_s12  ;;  %p31_p0 = scmp.ne.s32.totalorder %s2091_s8, %s2087_s7 }
   0x8   : > { %p22_p1 = scmp.eq.s32.totalorder %s21_s14, 0  ;;  %p32_p2 = scmp.eq.s32.totalorder %s2095_s9, 0 }
   0x9   : > { %p37_p3 = scmp.ne.s32.totalorder %s2087_s7, %s2083_s6  ;;  %p38_p4 = scmp.eq.s32.totalorder %s2137_s10, 0 }
   0xa   : > { %s2153_s15 = scalar_select %p22_p1, %s2091_s8, %s24_s13  }
   0xb   : > { %p2155_p5 = por %p32_p2, %p31_p0  ;;  %p2159_p6 = por %p38_p4, %p37_p3 }
   0xc   : > { %p61_p7 = scmp.eq.s32.totalorder %s2137_s10, 1  ;;  %p67_p8 = scmp.eq.s32.totalorder %s1610_s11, 1 }
   0xd   : > { %p1866_p10 = scmp.lt.s32.totalorder %s2095_s9, 2  ;;  %s87_s20 = sand.u32 1, %s2091_s8  }
   0xe   : > { %p2166_p11 = por %p61_p7, %p31_p0  ;;  %p2170_p12 = por %p67_p8, %p37_p3 }
   0xf   : > { %s1660_s21 = sshll.u32 %s2095_s9, 9  ;;  %s1613_s22 = sshll.u32 %s87_s20, 5 }
  0x10   : > { %s2540_s18 = scalar_select %p2166_p11, 1, 0 }
  0x11   : > { %s2541_s19 = scalar_select %p2170_p12, 1, 0 }
  0x12   : > { %s2179_s25 = scalar_lea.hbm %s2535_s0, %s1660_s21  ;;  %s91_s26 = scalar_lea.vmem [#allocation2], %s1613_s22 }
  0x13   : > { %s98_s27 = sshll.u32 %s91_s26, 4  ;;  %p2183_p13 = pnand %p1866_p10, %p2155_p5  ;;  %s2187_s27 = int_to_ptr.vmem [resolvable:$true] %s98_s27 }
  0x14   : > { %s2189_s29 = scalar_lea.sflag [#allocation3], %s87_s20  ;;  %s1999_s30 = scalar_lea.hbm %s2179_s25, 512 }
  0x15   : > { %p2000_p0 = scmp.ne.s32.totalorder %s2179_s25, %s1999_s30  ;;  %p2001_p1 = pneg %p2183_p13 }
  0x16   : > { %s2004_s4 = scalar_lea.hbm %s2535_s0, 1024  ;;  %p2005_p4 = scmp.lt.u32.totalorder %s2179_s25, %s2535_s0 }
  0x17   : > { %p2002_p2 = pnand %p2001_p1, %p2000_p0  ;;  %p2006_p5 = scmp.lt.u32.totalorder %s2004_s4, %s1999_s30 }
  0x18   : > { %p2008_p8 = scmp.lt.u32.totalorder %s1999_s30, %s2179_s25 }
  0x19   : > { %p2003_p3 = pneg %p2002_p2  ;;  %p2007_p7 = por %p2006_p5, %p2005_p4 }
  0x1b   : > { %p2009_p10 = por %p2008_p8, %p2007_p7 }
  0x1d   : > { %p2010_p9 = pnand %p2009_p10, %p2003_p3 }
  0x1f   : > { %2013 = shalt.err (!%p2010_p9)
}
  0x20   : > { %s2014_s13 = scalar_lea.vmem %s2187_s27, 512  ;;  %s2097_s14 = smov [#allocation2]  }
  0x21   : > { %p2015_p0 = scmp.ne.s32.totalorder %s2187_s27, %s2014_s13  ;;  %s2019_s16 = sshll.u32 %s2097_s14, 4  ;;  %s2020_s16 = int_to_ptr.vmem [resolvable:$false] %s2019_s16 }
  0x22   : > { %s2021_s20 = scalar_lea.vmem %s2020_s16, 1024  ;;  %p2022_p11 = scmp.lt.s32.totalorder %s2187_s27, %s2020_s16 }
  0x23   : > { %p2017_p2 = pnand %p2015_p0, %p2001_p1  ;;  %p2023_p4 = scmp.lt.s32.totalorder %s2021_s20, %s2014_s13 }
  0x25   : > { %p2018_p12 = pneg %p2017_p2  ;;  %p2024_p5 = por %p2023_p4, %p2022_p11 }
  0x27   : > { %p2025_p7 = pnand %p2024_p5, %p2018_p12 }
  0x29   : > { %2028 = shalt.err (!%p2025_p7)
}
  0x2a   : > { %s2098_s21 = smov 256   ;;  %s2099_s22 = smov 16  }
  0x2b   : > { %1861 = dma.hbm_to_vmem [thread:$0]  (!%p2183_p13), %s2179_s25, 512, %s2187_s27, %s2189_s29, %s2098_s21, %s2098_s21, %s2099_s22  }
  0x2c   : > { %p1616_p9 = scmp.ge.s32.totalorder %s2095_s9, 1  ;;  %p106_p1 = scmp.lt.s32.totalorder %s2095_s9, 3 }
  0x2e   : > { %p107_p3 = pnand %p1616_p9, %p106_p1 }
  0x2f   : > { %s2220_s23 = sand.u32 (!%p107_p3), 1, %s2087_s7  }
  0x30   : > { %110 = sbr.rel (%p107_p3) target bundleno = 3888 (0xf30), region = 24  ;;  %s1617_s24 = sshll.u32 (!%p107_p3), %s2220_s23, 5 }
  0x31   : > { %s113_s26 = scalar_lea.sflag (!%p107_p3), [#allocation3], %s2220_s23  ;;  %s2226_s30 = scalar_lea.vmem (!%p107_p3), [#allocation2], %s1617_s24 }
  0x37   : > { %2074 = dma.done.wait (%p2159_p6), %s113_s26, 512  }
  0x38   : > { %2076 = vsyncadd (%p2159_p6), %s113_s26, 4294966784  ;;  %v2233_v0 = vld [vmem:[%s2226_s30] sm:$0xff]  ;;  %vm146_vm0 = vcmask 261120   ;;  %v2236_v1 = vld [vmem:[%s2226_s30 + $0x10] sm:$0xff]  ;;  %s2100_s17 = smov 96   ;;  %v135_v16 = vlaneseq  ;;  %vm250_vm3 = vcmask 130048  }
  0x39   : > { %v2240_v2 = vmul.f32 %v2233_v0, %v2233_v0  ;;  %v2244_v3 = vmul.f32 %v2236_v1, %v2236_v1  ;;  %1714 = vmatprep.mubr.msk.f32.mxu0 %vm146_vm0, %v2233_v0  ;;  %vm2260_vm1 = vmpackc.low %vm146_vm0, %vm146_vm0  ;;  %v1800_v52 = vpack.c.bf16 %v2236_v1, %v2233_v0  ;;  %s2101_s25 = smov 64   ;;  %s2311_s27 = scalar_lea.vmem [#allocation5], %s1617_s24  ;;  %vm592_vm5 = vcmask 523520  }
  0x3a   : > { %v136_v17 = vshrl.u32 %v135_v16, 7  ;;  %v139_v19 = vand.u32 127, %v135_v16  ;;  %s2102_s28 = smov 32   ;;  %vm831_vm6 = vcmask 785920   ;;  %vm1070_vm7 = vcmask 1048320   ;;  %s1661_s29 = sshll.u32 %s2137_s10, 9 }
  0x3b   : > { %v147_v4 = vsel %vm146_vm0, %v2240_v2, 0.0  ;;  %v150_v5 = vsel %vm146_vm0, %v2244_v3, 0.0  ;;  %362 = vrot.lane.b32.xlu1 %v2240_v2, %s2100_s17  ;;  %1801 = vmatprep.subr.bf16.mxu1 %v1800_v52  ;;  %s1537_s2 = sshll.u32 %s2311_s27, 4  ;;  %s2485_s5 = scalar_lea.hbm %s2536_s1, %s1661_s29  ;;  %s2487_s2 = int_to_ptr.vmem [resolvable:$true] %s1537_s2 }
  0x3c   : > { %148 = vadd.xlane.f32.xlu0 %v147_v4  ;;  %v137_v18 = vadd.s32 8, %v136_v17  ;;  %vm2274_vm4 = vcmp.eq.s32.totalorder %v136_v17, %v139_v19  ;;  %1803 = vmatpush3.bf16.msra.mxu1 %v1800_v52  ;;  %s1524_s11 = scalar_lea.sflag [#allocation4], %s2220_s23  ;;  %s2029_s13 = scalar_lea.vmem %s2487_s2, 512 }
  0x3d   : > { %p2030_p6 = scmp.ne.s32.totalorder %s2487_s2, %s2029_s13  ;;  %p2549_p11 = scmp.ne.s32.totalorder %s2540_s18, 0 }
  0x3e   : > { %vm2270_vm2 = vcmp.eq.s32.totalorder %v137_v18, %v139_v19  ;;  %s2103_s10 = smov [#allocation5]  }
  0x3f   : > { %364 = vrot.lane.b32.xlu1 %v2244_v3, %s2100_s17  ;;  %p2031_p12 = pnand %p2030_p6, %p2549_p11  ;;  %s2033_s14 = sshll.u32 %s2103_s10, 4  ;;  %s2034_s14 = int_to_ptr.vmem [resolvable:$false] %s2033_s14 }
  0x40   : > { %151 = vadd.xlane.f32.xlu0 %v150_v5  ;;  %s2035_s16 = scalar_lea.vmem %s2034_s14, 1024  ;;  %p2036_p8 = scmp.lt.s32.totalorder %s2487_s2, %s2034_s14 }
  0x41   : > { %p2032_p13 = pneg %p2031_p12  ;;  %p2037_p10 = scmp.lt.s32.totalorder %s2035_s16, %s2029_s13 }
  0x43   : > { %p2038_p0 = por %p2037_p10, %p2036_p8 }
  0x45   : > { %p2039_p2 = pnand %p2038_p0, %p2032_p13 }
  0xad   : > { %v363_v26 = vpop.permute.xlu1 %362 }
  0xae   : > { %v368_v31 = vsel %vm146_vm0, %v363_v26, 0.0 }
  0xb1   : > { %v365_v32 = vpop.permute.xlu1 %364 }
  0xb2   : > { %v371_v33 = vsel %vm146_vm0, %v365_v32, 0.0 }
  0xc9   : > { %v149_v6 = vpop.xlane.xlu0 %148 }
  0xca   : > { %v153_v7 = vmax.f32 %v149_v6, 1e-24 }
  0xcc   : > { %1927 = vrsqrt.f32 %v153_v7 }
  0xcd   : > { %v152_v8 = vpop.xlane.xlu0 %151 }
  0xce   : > { %v154_v9 = vmax.f32 %v152_v8, 1e-24 }
  0xd0   : > { %1929 = vrsqrt.f32 %v154_v9 }
  0xd6   : > { %v1928_v10 = vpop.eup %1927 }
  0xd7   : > { %v157_v12 = vmul.f32 %v1928_v10, %v2233_v0 }
  0xda   : > { %v1930_v11 = vpop.eup %1929 }
  0xdb   : > { %v158_v13 = vmul.f32 %v1930_v11, %v2236_v1 }
  0xdd   : > { %v1794_v15 = vpack.c.bf16 %v158_v13, %v157_v12 }
  0xdf   : > { %1796 = vmatprep.subr.msk.bf16.mxu0 %vm2260_vm1, %v1794_v15 }
  0xe0   : > { %1799 = vmatpush3.bf16.xpose.msk.msra.mxu0 %vm2260_vm1, %v1794_v15 }
  0xe7   : > { %1715 = vmatmul.mubr.msk.f32.vlgmr.msra.gmra.mrb[0].mxu0 %vm146_vm0, %v2236_v1 }
 0x1ba   : > { %v1716_v20 = vpop.f32.mrb[0].mxu0 }
 0x1bb   : > { %v247_v22 = vmul.f32 0.17677669, %v1716_v20  ;;  %v237_v23 = vpop.f32.mrb[1].mxu0 }
 0x1bc   : > { %v246_v25 = vmul.f32 0.17677669, %v237_v23 }
 0x1bd   : > { %v249_v27 = vsel %vm2270_vm2, -0.0005, %v247_v22 }
 0x1be   : > { %v254_v28 = vsel %vm250_vm3, %v249_v27, -inf  ;;  %v248_v29 = vsel %vm2274_vm4, -0.0005, %v246_v25 }
 0x1bf   : > { %255 = vmax.xlane.f32.xlu1 %v254_v28  ;;  %v251_v30 = vsel %vm250_vm3, %v248_v29, -inf }
 0x1c0   : > { %252 = vmax.xlane.f32.xlu0 %v251_v30 }
 0x1c4   : > { %369 = vadd.xlane.f32.xlu0 %v368_v31 }
 0x1c8   : > { %372 = vadd.xlane.f32.xlu0 %v371_v33 }
 0x1d0   : > { %382 = vrot.lane.b32.xlu1 %v2233_v0, %s2100_s17 }
 0x24c   : > { %v256_v34 = vpop.xlane.xlu1 %255 }
 0x24d   : > { %v258_v35 = vsub.f32 %v249_v27, %v256_v34  ;;  %v253_v36 = vpop.xlane.xlu0 %252 }
 0x24e   : > { %v257_v37 = vsub.f32 %v248_v29, %v253_v36 }
 0x24f   : > { %v261_v38 = vmul.f32 1.442695, %v258_v35 }
 0x250   : > { %v259_v39 = vmul.f32 1.442695, %v257_v37  ;;  %v383_v59 = vpop.permute.xlu1 %382 }
 0x251   : > { %1931 = vpow2.f32 %v261_v38  ;;  %v370_v40 = vpop.xlane.xlu0 %369 }
 0x252   : > { %1933 = vpow2.f32 %v259_v39  ;;  %v374_v45 = vmax.f32 %v370_v40, 1e-24 }
 0x254   : > { %1935 = vrsqrt.f32 %v374_v45 }
 0x255   : > { %v373_v42 = vpop.xlane.xlu0 %372 }
 0x256   : > { %v375_v46 = vmax.f32 %v373_v42, 1e-24 }
 0x258   : > { %1937 = vrsqrt.f32 %v375_v46 }
 0x25b   : > { %v1932_v41 = vpop.eup %1931 }
 0x25c   : > { %v266_v43 = vsel %vm250_vm3, %v1932_v41, 0.0  ;;  %v1934_v44 = vpop.eup %1933 }
 0x25d   : > { %267 = vadd.xlane.f32.xlu0 %v266_v43  ;;  %v263_v47 = vsel %vm250_vm3, %v1934_v44, 0.0 }
 0x25e   : > { %v1936_v48 = vpop.eup %1935 }
 0x25f   : > { %v378_v50 = vmul.f32 %v1936_v48, %v2233_v0 }
 0x261   : > { %264 = vadd.xlane.f32.xlu0 %v263_v47 }
 0x262   : > { %v1938_v49 = vpop.eup %1937 }
 0x263   : > { %v379_v51 = vmul.f32 %v1938_v49, %v2236_v1 }
 0x265   : > { %v1907_v53 = vpack.i.bf16 %v379_v51, %v378_v50 }
 0x277   : > { %1908 = vrot.lane.b32.xlu0 %v1907_v53, %s2100_s17 }
 0x27b   : > { %384 = vrot.lane.b32.xlu0 %v2236_v1, %s2100_s17 }
 0x27f   : > { %601 = vrot.lane.b32.xlu0 %v2240_v2, %s2101_s25 }
 0x283   : > { %603 = vrot.lane.b32.xlu0 %v2244_v3, %s2101_s25 }
 0x2ea   : > { %v268_v54 = vpop.xlane.xlu0 %267 }
 0x2eb   : > { %1939 = vrcp.f32 %v268_v54 }
 0x2ee   : > { %v265_v55 = vpop.xlane.xlu0 %264 }
 0x2ef   : > { %1941 = vrcp.f32 %v265_v55 }
 0x2f2   : > { %v1909_v56 = vpop.permute.xlu0 %1908 }
 0x2f3   : > { %v1911_v57 = vunpack.i.h.bf16 %v1909_v56  ;;  %v1910_v58 = vunpack.i.l.bf16 %v1909_v56 }
 0x2f5   : > { %v1804_v60 = vpack.c.bf16 %v1911_v57, %v1910_v58  ;;  %v1940_v63 = vpop.eup %1939 }
 0x2f6   : > { %v385_v61 = vpop.permute.xlu0 %384  ;;  %v272_v6 = vmul.f32 %v1940_v63, %v1932_v41 }
 0x2f7   : > { %1806 = vmatprep.subr.msk.bf16.mxu1 %vm2260_vm1, %v1804_v60  ;;  %v1810_v62 = vpack.c.bf16 %v385_v61, %v383_v59 }
 0x2f9   : > { %v1942_v4 = vpop.eup %1941  ;;  %1811 = vmatprep.subr.bf16.mxu0 %v1810_v62 }
 0x2fa   : > { %v271_v5 = vmul.f32 %v1942_v4, %v1934_v44  ;;  %1813 = vmatpush3.bf16.msra.mxu0 %v1810_v62  ;;  %v602_v12 = vpop.permute.xlu0 %601 }
 0x2fb   : > { %v607_v19 = vsel %vm146_vm0, %v602_v12, 0.0 }
 0x2fc   : > { %1721 = vmatprep.mubr.msk.f32.mxu1 %vm250_vm3, %v271_v5 }
 0x2fd   : > { %1722 = vmatmul.mubr.msk.f32.vlgmr.msra.gmra.mrb[0].mxu1 %vm250_vm3, %v272_v6 }
 0x2fe   : > { %1809 = vmatpush3.bf16.xpose.msk.msra.mxu1 %vm2260_vm1, %v1804_v60  ;;  %1728 = vmatprep.mubr.msk.f32.mxu1 %vm146_vm0, %v383_v59  ;;  %v604_v20 = vpop.permute.xlu0 %603 }
 0x2ff   : > { %v610_v22 = vsel %vm146_vm0, %v604_v20, 0.0 }
 0x305   : > { %1729 = vmatmul.mubr.msk.f32.vlgmr.msra.gmra.mrb[2].mxu1 %vm146_vm0, %v385_v61 }
 0x3d0   : > { %v1723_v7 = vpop.f32.mrb[0].mxu1 }
 0x3d1   : > { %355 = vst.msk [vmem:[%s2311_s27 + $0x10] sm:$0xff] %vm146_vm0, %v1723_v7  ;;  %v345_v8 = vpop.f32.mrb[1].mxu1 }
 0x3d2   : > { %354 = vst.msk [vmem:[%s2311_s27] sm:$0xff] %vm146_vm0, %v345_v8 }
 0x3d8   : > { %v1730_v9 = vpop.f32.mrb[2].mxu1 }
 0x3d9   : > { %v476_v10 = vmul.f32 0.17677669, %v1730_v9  ;;  %v466_v11 = vpop.f32.mrb[3].mxu1 }
 0x3da   : > { %v475_v13 = vmul.f32 0.17677669, %v466_v11 }
 0x3db   : > { %v478_v15 = vsel %vm2270_vm2, -0.0005, %v476_v10 }
 0x3dc   : > { %v482_v16 = vsel %vm250_vm3, %v478_v15, -inf  ;;  %v477_v17 = vsel %vm2274_vm4, -0.0005, %v475_v13 }
 0x3dd   : > { %483 = vmax.xlane.f32.xlu0 %v482_v16  ;;  %v479_v18 = vsel %vm250_vm3, %v477_v17, -inf }
 0x3de   : > { %480 = vmax.xlane.f32.xlu1 %v479_v18 }
 0x3e1   : > { %608 = vadd.xlane.f32.xlu0 %v607_v19 }
 0x3e5   : > { %611 = vadd.xlane.f32.xlu0 %v610_v22 }
 0x46a   : > { %v484_v23 = vpop.xlane.xlu0 %483 }
 0x46b   : > { %v486_v25 = vsub.f32 %v478_v15, %v484_v23  ;;  %v481_v38 = vpop.xlane.xlu1 %480 }
 0x46c   : > { %v485_v39 = vsub.f32 %v477_v17, %v481_v38 }
 0x46d   : > { %v489_v26 = vmul.f32 1.442695, %v486_v25 }
 0x46e   : > { %v609_v27 = vpop.xlane.xlu0 %608  ;;  %v487_v40 = vmul.f32 1.442695, %v485_v39 }
 0x46f   : > { %1943 = vpow2.f32 %v489_v26  ;;  %v613_v28 = vmax.f32 %v609_v27, 1e-24 }
 0x471   : > { %1945 = vrsqrt.f32 %v613_v28 }
 0x472   : > { %v612_v29 = vpop.xlane.xlu0 %611 }
 0x473   : > { %v614_v30 = vmax.f32 %v612_v29, 1e-24 }
 0x475   : > { %1947 = vrsqrt.f32 %v614_v30 }
 0x476   : > { %1949 = vpow2.f32 %v487_v40 }
 0x479   : > { %v1944_v31 = vpop.eup %1943 }
 0x47a   : > { %v494_v32 = vsel %vm250_vm3, %v1944_v31, 0.0 }
 0x47b   : > { %495 = vadd.xlane.f32.xlu0 %v494_v32  ;;  %v1946_v33 = vpop.eup %1945 }
 0x47c   : > { %v617_v35 = vmul.f32 %v1946_v33, %v2233_v0 }
 0x47f   : > { %v1948_v34 = vpop.eup %1947 }
 0x480   : > { %v618_v36 = vmul.f32 %v1948_v34, %v2236_v1  ;;  %v1950_v41 = vpop.eup %1949 }
 0x481   : > { %v491_v42 = vsel %vm250_vm3, %v1950_v41, 0.0 }
 0x482   : > { %v1912_v37 = vpack.i.bf16 %v618_v36, %v617_v35 }
 0x484   : > { %1913 = vrot.lane.b32.xlu1 %v1912_v37, %s2101_s25 }
 0x491   : > { %621 = vrot.lane.b32.xlu0 %v2233_v0, %s2101_s25 }
 0x4a8   : > { %492 = vadd.xlane.f32.xlu1 %v491_v42 }
 0x4b9   : > { %623 = vrot.lane.b32.xlu1 %v2236_v1, %s2101_s25 }
 0x4bd   : > { %840 = vrot.lane.b32.xlu1 %v2240_v2, %s2102_s28 }
 0x4c1   : > { %842 = vrot.lane.b32.xlu1 %v2244_v3, %s2102_s28 }
 0x4f6   : > { %v1914_v43 = vpop.permute.xlu1 %1913 }
 0x4f7   : > { %v1916_v44 = vunpack.i.h.bf16 %v1914_v43  ;;  %v1915_v45 = vunpack.i.l.bf16 %v1914_v43 }
 0x4f9   : > { %v1814_v46 = vpack.c.bf16 %v1916_v44, %v1915_v45 }
 0x4fb   : > { %1816 = vmatprep.subr.msk.bf16.mxu0 %vm2260_vm1, %v1814_v46 }
 0x508   : > { %v496_v47 = vpop.xlane.xlu0 %495 }
 0x509   : > { %1951 = vrcp.f32 %v496_v47 }
 0x50c   : > { %v622_v49 = vpop.permute.xlu0 %621 }
 0x513   : > { %v1952_v2 = vpop.eup %1951 }
 0x514   : > { %v500_v3 = vmul.f32 %v1952_v2, %v1944_v31 }
 0x535   : > { %v493_v48 = vpop.xlane.xlu1 %492 }
 0x536   : > { %1953 = vrcp.f32 %v493_v48 }
 0x539   : > { %v624_v50 = vpop.permute.xlu1 %623 }
 0x53a   : > { %v1820_v51 = vpack.c.bf16 %v624_v50, %v622_v49 }
 0x53c   : > { %1821 = vmatprep.subr.bf16.mxu1 %v1820_v51 }
 0x53d   : > { %1823 = vmatpush3.bf16.msra.mxu1 %v1820_v51  ;;  %v841_v60 = vpop.permute.xlu1 %840  ;;  %v2386_v51 = vld [vmem:[%s2226_s30 + $0x8] sm:$0xff] }
 0x53e   : > { %v846_v5 = vsel %vm146_vm0, %v841_v60, 0.0  ;;  %v1075_v2 = vmul.f32 %v2386_v51, %v2386_v51 }
 0x540   : > { %v1954_v52 = vpop.eup %1953 }
 0x541   : > { %v499_v53 = vmul.f32 %v1954_v52, %v1950_v41  ;;  %v843_v6 = vpop.permute.xlu1 %842  ;;  %v1077_v52 = vsel %vm146_vm0, %v1075_v2, 0.0 }
 0x542   : > { %v849_v7 = vsel %vm146_vm0, %v843_v6, 0.0 }
 0x543   : > { %1735 = vmatprep.mubr.msk.f32.mxu0 %vm250_vm3, %v499_v53  ;;  %v2392_v53 = vld [vmem:[%s2226_s30 + $0x18] sm:$0xff] }
 0x544   : > { %1736 = vmatmul.mubr.msk.f32.vlgmr.msra.gmra.mrb[2].mxu0 %vm250_vm3, %v500_v3  ;;  %v1076_v3 = vmul.f32 %v2392_v53, %v2392_v53 }
 0x545   : > { %1819 = vmatpush3.bf16.xpose.msk.msra.mxu0 %vm2260_vm1, %v1814_v46  ;;  %1742 = vmatprep.mubr.msk.f32.mxu0 %vm146_vm0, %v622_v49 }
 0x54c   : > { %1743 = vmatmul.mubr.msk.f32.vlgmr.msra.gmra.mrb[4].mxu0 %vm146_vm0, %v624_v50 }
 0x617   : > { %v2346_v54 = vpop.f32.mrb[2].mxu0 }
 0x618   : > { %v2348_v55 = vpop.f32.mrb[3].mxu0 }
 0x61f   : > { %v1744_v56 = vpop.f32.mrb[4].mxu0 }
 0x620   : > { %v715_v57 = vmul.f32 0.17677669, %v1744_v56  ;;  %v705_v58 = vpop.f32.mrb[5].mxu0  ;;  %v1080_v56 = vsel %vm146_vm0, %v1076_v3, 0.0 }
 0x621   : > { %v714_v59 = vmul.f32 0.17677669, %v705_v58 }
 0x622   : > { %v717_v61 = vsel %vm2270_vm2, -0.0005, %v715_v57 }
 0x623   : > { %v721_v62 = vsel %vm250_vm3, %v717_v61, -inf  ;;  %v716_v63 = vsel %vm2274_vm4, -0.0005, %v714_v59 }
 0x624   : > { %722 = vmax.xlane.f32.xlu1 %v721_v62  ;;  %v718_v4 = vsel %vm250_vm3, %v716_v63, -inf }
 0x625   : > { %719 = vmax.xlane.f32.xlu0 %v718_v4 }
 0x629   : > { %847 = vadd.xlane.f32.xlu0 %v846_v5 }
 0x62d   : > { %850 = vadd.xlane.f32.xlu0 %v849_v7 }
 0x6b1   : > { %v723_v8 = vpop.xlane.xlu1 %722 }
 0x6b2   : > { %v725_v9 = vsub.f32 %v717_v61, %v723_v8  ;;  %v720_v10 = vpop.xlane.xlu0 %719 }
 0x6b3   : > { %v724_v11 = vsub.f32 %v716_v63, %v720_v10 }
 0x6b4   : > { %v728_v12 = vmul.f32 1.442695, %v725_v9 }
 0x6b5   : > { %v726_v13 = vmul.f32 1.442695, %v724_v11 }
 0x6b6   : > { %1955 = vpow2.f32 %v728_v12  ;;  %v848_v15 = vpop.xlane.xlu0 %847 }
 0x6b7   : > { %1957 = vpow2.f32 %v726_v13  ;;  %v852_v17 = vmax.f32 %v848_v15, 1e-24 }
 0x6b9   : > { %1959 = vrsqrt.f32 %v852_v17 }
 0x6ba   : > { %v851_v16 = vpop.xlane.xlu0 %850 }
 0x6bb   : > { %v853_v19 = vmax.f32 %v851_v16, 1e-24 }
 0x6bd   : > { %1961 = vrsqrt.f32 %v853_v19 }
 0x6c0   : > { %v1956_v18 = vpop.eup %1955 }
 0x6c1   : > { %v1958_v20 = vpop.eup %1957  ;;  %v733_v22 = vsel %vm250_vm3, %v1956_v18, 0.0 }
 0x6c2   : > { %734 = vadd.xlane.f32.xlu1 %v733_v22  ;;  %v730_v23 = vsel %vm250_vm3, %v1958_v20, 0.0 }
 0x6c3   : > { %731 = vadd.xlane.f32.xlu0 %v730_v23  ;;  %v1960_v25 = vpop.eup %1959 }
 0x6c4   : > { %v856_v27 = vmul.f32 %v1960_v25, %v2233_v0 }
 0x6c7   : > { %v1962_v26 = vpop.eup %1961 }
 0x6c8   : > { %v857_v28 = vmul.f32 %v1962_v26, %v2236_v1 }
 0x6ca   : > { %v1917_v29 = vpack.i.bf16 %v857_v28, %v856_v27 }
 0x6d3   : > { %860 = vrot.lane.b32.xlu1 %v2233_v0, %s2102_s28 }
 0x6d7   : > { %862 = vrot.lane.b32.xlu1 %v2236_v1, %s2102_s28 }
 0x6d9   : > { %1918 = vrot.lane.b32.xlu0 %v1917_v29, %s2102_s28 }
 0x74f   : > { %v735_v30 = vpop.xlane.xlu1 %734 }
 0x750   : > { %1963 = vrcp.f32 %v735_v30  ;;  %v732_v31 = vpop.xlane.xlu0 %731 }
 0x751   : > { %1965 = vrcp.f32 %v732_v31 }
 0x753   : > { %v861_v32 = vpop.permute.xlu1 %860 }
 0x754   : > { %v1919_v33 = vpop.permute.xlu0 %1918 }
 0x755   : > { %v1921_v34 = vunpack.i.h.bf16 %v1919_v33  ;;  %v1920_v35 = vunpack.i.l.bf16 %v1919_v33 }
 0x757   : > { %v1824_v36 = vpack.c.bf16 %v1921_v34, %v1920_v35  ;;  %v863_v37 = vpop.permute.xlu1 %862 }
 0x758   : > { %v1830_v38 = vpack.c.bf16 %v863_v37, %v861_v32 }
 0x759   : > { %1826 = vmatprep.subr.msk.bf16.mxu1 %vm2260_vm1, %v1824_v36 }
 0x75a   : > { %v1964_v0 = vpop.eup %1963  ;;  %1831 = vmatprep.subr.bf16.mxu0 %v1830_v38 }
 0x75b   : > { %v1966_v39 = vpop.eup %1965  ;;  %1833 = vmatpush3.bf16.msra.mxu0 %v1830_v38  ;;  %v739_v40 = vmul.f32 %v1964_v0, %v1956_v18 }
 0x75c   : > { %v738_v1 = vmul.f32 %v1966_v39, %v1958_v20 }
 0x75e   : > { %1749 = vmatprep.mubr.msk.f32.mxu1 %vm250_vm3, %v738_v1 }
 0x75f   : > { %1750 = vmatmul.mubr.msk.f32.vlgmr.msra.gmra.mrb[4].mxu1 %vm250_vm3, %v739_v40 }
 0x760   : > { %1829 = vmatpush3.bf16.xpose.msk.msra.mxu1 %vm2260_vm1, %v1824_v36  ;;  %1756 = vmatprep.mubr.msk.f32.mxu1 %vm146_vm0, %v861_v32 }
 0x767   : > { %1757 = vmatmul.mubr.msk.f32.vlgmr.msra.gmra.mrb[6].mxu1 %vm146_vm0, %v863_v37 }
 0x832   : > { %v2375_v41 = vpop.f32.mrb[4].mxu1 }
 0x833   : > { %v2377_v42 = vpop.f32.mrb[5].mxu1 }
 0x83a   : > { %v1758_v43 = vpop.f32.mrb[6].mxu1 }
 0x83b   : > { %v954_v44 = vmul.f32 0.17677669, %v1758_v43  ;;  %v944_v45 = vpop.f32.mrb[7].mxu1 }
 0x83c   : > { %v953_v46 = vmul.f32 0.17677669, %v944_v45 }
 0x83d   : > { %v956_v47 = vsel %vm2270_vm2, -0.0005, %v954_v44 }
 0x83e   : > { %v960_v48 = vsel %vm250_vm3, %v956_v47, -inf  ;;  %v955_v49 = vsel %vm2274_vm4, -0.0005, %v953_v46 }
 0x83f   : > { %961 = vmax.xlane.f32.xlu0 %v960_v48  ;;  %v957_v50 = vsel %vm250_vm3, %v955_v49, -inf }
 0x840   : > { %958 = vmax.xlane.f32.xlu1 %v957_v50 }
 0x843   : > { %1078 = vadd.xlane.f32.xlu0 %v1077_v52 }
 0x847   : > { %1081 = vadd.xlane.f32.xlu0 %v1080_v56 }
 0x8cc   : > { %v962_v57 = vpop.xlane.xlu0 %961 }
 0x8cd   : > { %v964_v58 = vsub.f32 %v956_v47, %v962_v57  ;;  %v959_v59 = vpop.xlane.xlu1 %958  ;;  %v1840_v47 = vpack.c.bf16 %v2392_v53, %v2386_v51 }
 0x8ce   : > { %v963_v60 = vsub.f32 %v955_v49, %v959_v59 }
 0x8cf   : > { %v967_v61 = vmul.f32 1.442695, %v964_v58  ;;  %1841 = vmatprep.subr.bf16.mxu1 %v1840_v47 }
 0x8d0   : > { %v965_v62 = vmul.f32 1.442695, %v963_v60  ;;  %v1079_v7 = vpop.xlane.xlu0 %1078  ;;  %1843 = vmatpush3.bf16.msra.mxu1 %v1840_v47 }
 0x8d1   : > { %1967 = vpow2.f32 %v967_v61  ;;  %v1083_v8 = vmax.f32 %v1079_v7, 1e-24 }
 0x8d2   : > { %1969 = vpow2.f32 %v965_v62 }
 0x8d3   : > { %1971 = vrsqrt.f32 %v1083_v8 }
 0x8d4   : > { %v1082_v9 = vpop.xlane.xlu0 %1081 }
 0x8d5   : > { %v1084_v10 = vmax.f32 %v1082_v9, 1e-24 }
 0x8d7   : > { %1973 = vrsqrt.f32 %v1084_v10 }
 0x8db   : > { %v1968_v63 = vpop.eup %1967 }
 0x8dc   : > { %v1970_v4 = vpop.eup %1969  ;;  %v972_v5 = vsel %vm250_vm3, %v1968_v63, 0.0 }
 0x8dd   : > { %973 = vadd.xlane.f32.xlu0 %v972_v5  ;;  %v969_v6 = vsel %vm250_vm3, %v1970_v4, 0.0  ;;  %v1972_v11 = vpop.eup %1971 }
 0x8de   : > { %970 = vadd.xlane.f32.xlu1 %v969_v6  ;;  %v1087_v13 = vmul.f32 %v1972_v11, %v2386_v51 }
 0x8e1   : > { %v1974_v12 = vpop.eup %1973 }
 0x8e2   : > { %v1088_v15 = vmul.f32 %v1974_v12, %v2392_v53 }
 0x8e4   : > { %v1834_v16 = vpack.c.bf16 %v1088_v15, %v1087_v13 }
 0x8e6   : > { %1836 = vmatprep.subr.msk.bf16.mxu0 %vm2260_vm1, %v1834_v16 }
 0x8ef   : > { %1291 = vrot.lane.b32.xlu1 %v1075_v2, %s2100_s17 }
 0x8f3   : > { %1293 = vrot.lane.b32.xlu0 %v1076_v3, %s2100_s17 }
 0x96a   : > { %v974_v17 = vpop.xlane.xlu0 %973 }
 0x96b   : > { %1975 = vrcp.f32 %v974_v17  ;;  %v971_v18 = vpop.xlane.xlu1 %970 }
 0x96c   : > { %1977 = vrcp.f32 %v971_v18 }
 0x96e   : > { %v1294_v32 = vpop.permute.xlu0 %1293 }
 0x96f   : > { %v1292_v35 = vpop.permute.xlu1 %1291  ;;  %v1300_v37 = vsel %vm146_vm0, %v1294_v32, 0.0 }
 0x970   : > { %v1297_v38 = vsel %vm146_vm0, %v1292_v35, 0.0 }
 0x975   : > { %v1976_v19 = vpop.eup %1975 }
 0x976   : > { %v1978_v20 = vpop.eup %1977  ;;  %v978_v23 = vmul.f32 %v1976_v19, %v1968_v63 }
 0x977   : > { %v977_v22 = vmul.f32 %v1978_v20, %v1970_v4 }
 0x979   : > { %1763 = vmatprep.mubr.msk.f32.mxu0 %vm250_vm3, %v977_v22 }
 0x97a   : > { %1764 = vmatmul.mubr.msk.f32.vlgmr.msra.gmra.mrb[6].mxu0 %vm250_vm3, %v978_v23 }
 0x97b   : > { %1839 = vmatpush3.bf16.xpose.msk.msra.mxu0 %vm2260_vm1, %v1834_v16  ;;  %1770 = vmatprep.mubr.msk.f32.mxu0 %vm146_vm0, %v2386_v51 }
 0x982   : > { %1771 = vmatmul.mubr.msk.f32.vlgmr.msra.gmra.mrb[8].mxu0 %vm146_vm0, %v2392_v53 }
 0xa4d   : > { %v2413_v25 = vpop.f32.mrb[6].mxu0 }
 0xa4e   : > { %v2415_v26 = vpop.f32.mrb[7].mxu0 }
 0xa55   : > { %v1772_v27 = vpop.f32.mrb[8].mxu0 }
 0xa56   : > { %v1177_v28 = vmul.f32 0.17677669, %v1772_v27  ;;  %v1167_v29 = vpop.f32.mrb[9].mxu0 }
 0xa57   : > { %v1176_v30 = vmul.f32 0.17677669, %v1167_v29 }
 0xa58   : > { %v1179_v31 = vsel %vm2270_vm2, -0.0005, %v1177_v28 }
 0xa59   : > { %v1183_v33 = vsel %vm250_vm3, %v1179_v31, -inf  ;;  %v1178_v34 = vsel %vm2274_vm4, -0.0005, %v1176_v30 }
 0xa5a   : > { %1184 = vmax.xlane.f32.xlu0 %v1183_v33  ;;  %v1180_v36 = vsel %vm250_vm3, %v1178_v34, -inf }
 0xa5b   : > { %1181 = vmax.xlane.f32.xlu1 %v1180_v36 }
 0xa5e   : > { %1301 = vadd.xlane.f32.xlu0 %v1300_v37 }
 0xa5f   : > { %1298 = vadd.xlane.f32.xlu1 %v1297_v38 }
 0xae7   : > { %v1185_v0 = vpop.xlane.xlu0 %1184 }
 0xae8   : > { %v1187_v39 = vsub.f32 %v1179_v31, %v1185_v0  ;;  %v1182_v1 = vpop.xlane.xlu1 %1181 }
 0xae9   : > { %v1186_v57 = vsub.f32 %v1178_v34, %v1182_v1 }
 0xaea   : > { %v1190_v40 = vmul.f32 1.442695, %v1187_v39 }
 0xaeb   : > { %v1302_v43 = vpop.xlane.xlu0 %1301  ;;  %v1188_v58 = vmul.f32 1.442695, %v1186_v57 }
 0xaec   : > { %1979 = vpow2.f32 %v1190_v40  ;;  %v1304_v44 = vmax.f32 %v1302_v43, 1e-24  ;;  %v1299_v45 = vpop.xlane.xlu1 %1298 }
 0xaed   : > { %v1303_v46 = vmax.f32 %v1299_v45, 1e-24 }
 0xaee   : > { %1981 = vrsqrt.f32 %v1304_v44 }
 0xaef   : > { %1983 = vrsqrt.f32 %v1303_v46 }
 0xaf0   : > { %1985 = vpow2.f32 %v1188_v58 }
 0xaf6   : > { %v1980_v48 = vpop.eup %1979 }
 0xaf7   : > { %v1195_v49 = vsel %vm250_vm3, %v1980_v48, 0.0 }
 0xaf8   : > { %v1982_v50 = vpop.eup %1981  ;;  %1196 = vadd.xlane.f32.xlu0 %v1195_v49 }
 0xaf9   : > { %v1984_v2 = vpop.eup %1983  ;;  %v1308_v52 = vmul.f32 %v1982_v50, %v2392_v53 }
 0xafa   : > { %v1307_v3 = vmul.f32 %v1984_v2, %v2386_v51  ;;  %v1986_v59 = vpop.eup %1985 }
 0xafb   : > { %v1192_v60 = vsel %vm250_vm3, %v1986_v59, 0.0 }
 0xafc   : > { %v1922_v56 = vpack.i.bf16 %v1308_v52, %v1307_v3 }
 0xafe   : > { %1923 = vrot.lane.b32.xlu1 %v1922_v56, %s2100_s17 }
 0xb0e   : > { %1311 = vrot.lane.b32.xlu0 %v2386_v51, %s2100_s17 }
 0xb22   : > { %1193 = vadd.xlane.f32.xlu1 %v1192_v60 }
 0xb33   : > { %1313 = vrot.lane.b32.xlu1 %v2392_v53, %s2100_s17 }
 0xb70   : > { %v1924_v61 = vpop.permute.xlu1 %1923 }
 0xb71   : > { %v1926_v62 = vunpack.i.h.bf16 %v1924_v61  ;;  %v1925_v63 = vunpack.i.l.bf16 %v1924_v61 }
 0xb73   : > { %v1844_v4 = vpack.c.bf16 %v1926_v62, %v1925_v63 }
 0xb75   : > { %1846 = vmatprep.subr.msk.bf16.mxu1 %vm2260_vm1, %v1844_v4 }
 0xb85   : > { %v1197_v5 = vpop.xlane.xlu0 %1196 }
 0xb86   : > { %1987 = vrcp.f32 %v1197_v5 }
 0xb89   : > { %v1312_v51 = vpop.permute.xlu0 %1311 }
 0xb90   : > { %v1988_v9 = vpop.eup %1987 }
 0xb91   : > { %v1201_v11 = vmul.f32 %v1988_v9, %v1980_v48 }
 0xbaf   : > { %v1194_v6 = vpop.xlane.xlu1 %1193 }
 0xbb0   : > { %1989 = vrcp.f32 %v1194_v6 }
 0xbb3   : > { %v1314_v7 = vpop.permute.xlu1 %1313 }
 0xbb4   : > { %v1850_v8 = vpack.c.bf16 %v1314_v7, %v1312_v51 }
 0xbb6   : > { %1851 = vmatprep.subr.bf16.mxu0 %v1850_v8 }
 0xbb7   : > { %1853 = vmatpush3.bf16.msra.mxu0 %v1850_v8 }
 0xbba   : > { %v1990_v53 = vpop.eup %1989 }
 0xbbb   : > { %v1200_v10 = vmul.f32 %v1990_v53, %v1986_v59 }
 0xbbd   : > { %1777 = vmatprep.mubr.msk.f32.mxu1 %vm250_vm3, %v1200_v10 }
 0xbbe   : > { %1778 = vmatmul.mubr.msk.f32.vlgmr.msra.gmra.mrb[8].mxu1 %vm250_vm3, %v1201_v11 }
 0xbbf   : > { %1849 = vmatpush3.bf16.xpose.msk.msra.mxu1 %vm2260_vm1, %v1844_v4  ;;  %1784 = vmatprep.mubr.msk.f32.mxu1 %vm146_vm0, %v1312_v51 }
 0xbc6   : > { %1785 = vmatmul.mubr.msk.f32.vlgmr.msra.gmra.mrb[10].mxu1 %vm146_vm0, %v1314_v7 }
 0xc91   : > { %v1779_v12 = vpop.f32.mrb[8].mxu1 }
 0xc92   : > { %1284 = vst.msk [vmem:[%s2311_s27 + $0x18] sm:$0xff] %vm146_vm0, %v1779_v12  ;;  %v1274_v13 = vpop.f32.mrb[9].mxu1 }
 0xc93   : > { %1283 = vst.msk [vmem:[%s2311_s27 + $0x8] sm:$0xff] %vm146_vm0, %v1274_v13 }
 0xc99   : > { %v1786_v15 = vpop.f32.mrb[10].mxu1 }
 0xc9a   : > { %v1405_v16 = vmul.f32 0.17677669, %v1786_v15  ;;  %v1395_v17 = vpop.f32.mrb[11].mxu1 }
 0xc9b   : > { %v1404_v18 = vmul.f32 0.17677669, %v1395_v17 }
 0xc9c   : > { %v1407_v19 = vsel %vm2270_vm2, -0.0005, %v1405_v16 }
 0xc9d   : > { %v1411_v14 = vsel %vm250_vm3, %v1407_v19, -inf  ;;  %v1406_v20 = vsel %vm2274_vm4, -0.0005, %v1404_v18 }
 0xc9e   : > { %1412 = vmax.xlane.f32.xlu0 %v1411_v14  ;;  %v1408_v22 = vsel %vm250_vm3, %v1406_v20, -inf }
 0xc9f   : > { %1409 = vmax.xlane.f32.xlu1 %v1408_v22 }
 0xd2b   : > { %v1413_v23 = vpop.xlane.xlu0 %1412 }
 0xd2c   : > { %v1415_v27 = vsub.f32 %v1407_v19, %v1413_v23  ;;  %v1410_v28 = vpop.xlane.xlu1 %1409 }
 0xd2d   : > { %v1414_v29 = vsub.f32 %v1406_v20, %v1410_v28 }
 0xd2e   : > { %v1418_v30 = vmul.f32 1.442695, %v1415_v27 }
 0xd2f   : > { %v1416_v31 = vmul.f32 1.442695, %v1414_v29 }
 0xd30   : > { %1991 = vpow2.f32 %v1418_v30 }
 0xd31   : > { %1993 = vpow2.f32 %v1416_v31 }
 0xd3a   : > { %v1992_v32 = vpop.eup %1991 }
 0xd3b   : > { %v1994_v21 = vpop.eup %1993  ;;  %v1423_v33 = vsel %vm250_vm3, %v1992_v32, 0.0 }
 0xd3c   : > { %1424 = vadd.xlane.f32.xlu1 %v1423_v33  ;;  %v1420_v24 = vsel %vm250_vm3, %v1994_v21, 0.0 }
 0xd3d   : > { %1421 = vadd.xlane.f32.xlu0 %v1420_v24 }
 0xd4d   : > { %588 = vrot.lane.b32.xlu1 %v2346_v54, %s2102_s28 }
 0xd51   : > { %825 = vrot.lane.b32.xlu1 %v2377_v42, %s2101_s25 }
 0xd53   : > { %586 = vrot.lane.b32.xlu0 %v2348_v55, %s2102_s28 }
 0xd55   : > { %827 = vrot.lane.b32.xlu1 %v2375_v41, %s2101_s25 }
 0xd57   : > { %1064 = vrot.lane.b32.xlu0 %v2415_v26, %s2100_s17 }
 0xd59   : > { %1066 = vrot.lane.b32.xlu1 %v2413_v25, %s2100_s17 }
 0xdc9   : > { %v1425_v34 = vpop.xlane.xlu1 %1424 }
 0xdca   : > { %1995 = vrcp.f32 %v1425_v34  ;;  %v1422_v54 = vpop.xlane.xlu0 %1421 }
 0xdcb   : > { %1997 = vrcp.f32 %v1422_v54 }
 0xdcd   : > { %v589_v42 = vpop.permute.xlu1 %588 }
 0xdce   : > { %594 = vst.msk [vmem:[%s2311_s27 + $0x10] sm:$0xff] %vm592_vm5, %v589_v42  ;;  %v587_v55 = vpop.permute.xlu0 %586 }
 0xdcf   : > { %593 = vst.msk [vmem:[%s2311_s27] sm:$0xff] %vm592_vm5, %v587_v55 }
 0xdd1   : > { %v826_v41 = vpop.permute.xlu1 %825 }
 0xdd2   : > { %832 = vst.msk [vmem:[%s2311_s27] sm:$0xff] %vm831_vm6, %v826_v41  ;;  %v1065_v26 = vpop.permute.xlu0 %1064 }
 0xdd3   : > { %1071 = vst.msk [vmem:[%s2311_s27] sm:$0xff] %vm1070_vm7, %v1065_v26 }
 0xdd4   : > { %v1996_v25 = vpop.eup %1995 }
 0xdd5   : > { %v1998_v35 = vpop.eup %1997  ;;  %v828_v36 = vpop.permute.xlu1 %827  ;;  %v1429_v38 = vmul.f32 %v1996_v25, %v1992_v32 }
 0xdd6   : > { %833 = vst.msk [vmem:[%s2311_s27 + $0x10] sm:$0xff] %vm831_vm6, %v828_v36  ;;  %v1428_v37 = vmul.f32 %v1998_v35, %v1994_v21 }
 0xdd8   : > { %1791 = vmatprep.mubr.msk.f32.mxu0 %vm250_vm3, %v1428_v37 }
 0xdd9   : > { %1792 = vmatmul.mubr.msk.f32.vlgmr.msra.gmra.mrb[10].mxu0 %vm250_vm3, %v1429_v38  ;;  %v1067_v0 = vpop.permute.xlu1 %1066 }
 0xdda   : > { %1072 = vst.msk [vmem:[%s2311_s27 + $0x10] sm:$0xff] %vm1070_vm7, %v1067_v0 }
 0xeac   : > { %v1793_v39 = vpop.f32.mrb[10].mxu0 }
 0xead   : > { %1517 = vrot.lane.b32.xlu1 %v1793_v39, %s2102_s28  ;;  %v1504_v1 = vpop.f32.mrb[11].mxu0 }
 0xeae   : > { %1515 = vrot.lane.b32.xlu0 %v1504_v1, %s2102_s28 }
 0xf1f   : > { %v1518_v40 = vpop.permute.xlu1 %1517 }
 0xf20   : > { %1522 = vst.msk [vmem:[%s2311_s27 + $0x18] sm:$0xff] %vm592_vm5, %v1518_v40  ;;  %v1516_v43 = vpop.permute.xlu0 %1515 }
 0xf21   : > { %1521 = vst.msk [vmem:[%s2311_s27 + $0x8] sm:$0xff] %vm592_vm5, %v1516_v43 }
 0xf22   : > { %2042 = shalt.err (!%p2039_p2)
}
 0xf23   : > { %s2043_s20 = scalar_lea.hbm %s2485_s5, 512  ;;  %s2047_s24 = scalar_lea.hbm %s2536_s1, 1024 }
 0xf24   : > { %p2044_p4 = scmp.ne.s32.totalorder %s2485_s5, %s2043_s20  ;;  %p2048_p9 = scmp.lt.u32.totalorder %s2485_s5, %s2536_s1 }
 0xf25   : > { %p2049_p1 = scmp.lt.u32.totalorder %s2047_s24, %s2043_s20  ;;  %p2051_p6 = scmp.lt.u32.totalorder %s2043_s20, %s2485_s5 }
 0xf26   : > { %p2045_p5 = pnand %p2044_p4, %p2549_p11 }
 0xf27   : > { %p2050_p3 = por %p2049_p1, %p2048_p9 }
 0xf28   : > { %p2046_p7 = pneg %p2045_p5 }
 0xf29   : > { %p2052_p12 = por %p2051_p6, %p2050_p3 }
 0xf2b   : > { %p2053_p13 = pnand %p2052_p12, %p2046_p7 }
 0xf2d   : > { %2056 = shalt.err (!%p2053_p13)
}
 0xf2e   : > { %s2104_s17 = smov 256   ;;  %s2105_s25 = smov 16  }
 0xf2f   : > { %1856 = dma.vmem_to_hbm [thread:$0]  (%p2549_p11), %s2487_s2, 512, %s2485_s5, %s1524_s11, %s2104_s17, %s2104_s17, %s2105_s25  }
 0xf30 PF: > { %s1552_s27 = sand.u32 1, %s2083_s6   ;;  %p2550_p8 = scmp.ne.s32.totalorder %s2541_s19, 0 }
 0xf31   : > { %p2551_p10 = scmp.ge.s32.totalorder %s2095_s9, 2  ;;  %s1553_s28 = scalar_lea.sflag [#allocation4], %s1552_s27 }
 0xf33   : > { %p1863_p0 = pnand %p2551_p10, %p2550_p8 }
 0xf35   : > { %2078 = dma.done.wait (!%p1863_p0), %s1553_s28, 512  }
 0xf36   : > { %2080 = vsyncadd (!%p1863_p0), %s1553_s28, 4294966784  ;;  %p14_p2 = scmp.ge.s32.totalorder %s2141_s12, 4   ;;  %s2552_s6 = smov %s2087_s7 }
 0xf37   : > { %s2553_s7 = smov %s2091_s8  ;;  %s2554_s8 = smov %s2153_s15 }
 0xf38   : > { %s2555_s9 = smov %s2141_s12  ;;  %16 = sbr.rel (!%p14_p2) target bundleno = 5 (0x5), region = 69 }
 0xf3f   :  { %1558 = vsyncpa [#allocation3], 1 }
 0xf40   :  { %1560 = vsyncpa [#allocation3 + $0x1], 1 }
 0xf41   :  { %1561 = vsyncpa [#allocation4], 1 }
 0xf42   :  { %1563 = vsyncpa [#allocation4 + $0x1], 1 }

</bundles_post_ra>
